<compile_context>
chip_gen: v7x
topology: tpu7x:2x2x1
jax: 0.10.0
libtpu: 0.0.40
codegen_flags: <defaults>
</compile_context>

<pallas_src>
import functools

import jax
import jax.numpy as jnp
from jax.experimental import pallas as pl
from jax.experimental.pallas import tpu as pltpu


def _round_up(x, m):
    return ((x + m - 1) // m) * m


def _vmem_capacity_bytes():
    """Physical per-TensorCore VMEM; conservative fallback if query fails."""
    try:
        info = pltpu.get_tpu_info()
        for attr in ("vmem_capacity_bytes", "vmem_bytes", "vmem_size_bytes"):
            v = getattr(info, attr, None)
            if v:
                return int(v)
    except Exception:
        pass
    return 64 * 1024 * 1024  # v7x-safe default


# ---------------------------------------------------------------------------
# Kernel: whole MLP fused per batch tile.
# ---------------------------------------------------------------------------
def _decoder_mlp_kernel(n_layers, z_ref, *refs):
    """refs = (w0, b0, w1, b1, ..., o_ref)."""
    param_refs = refs[: 2 * n_layers]
    o_ref = refs[2 * n_layers]

    h = z_ref[...]                                          # bf16 [TM, l_pad]
    for i in range(n_layers):                               # tiny static loop
        w = param_refs[2 * i][...]                          # bf16 [in_pad, out_pad]
        b = param_refs[2 * i + 1][...]                      # f32  [1, out_pad]
        acc = jnp.dot(h, w, preferred_element_type=jnp.float32) + b
        if i + 1 < n_layers:
            # ReLU, then immediately narrow to bf16: halves the VMEM temp and
            # the next matmul's LHS bytes; numerically identical to casting
            # at the next dot.
            h = jnp.maximum(acc, 0.0).astype(jnp.bfloat16)
        else:
            o_ref[...] = jax.nn.sigmoid(acc).astype(o_ref.dtype)


# ---------------------------------------------------------------------------
# One-time parameter preparation (pad + cast).  Cache the result.
# ---------------------------------------------------------------------------
def prepare_decoder_params(params, latent_size):
    """params: list of (W [in, out] f32, b [1, out] or [out] f32).

    Returns (padded_params, meta).  Padded weights are bf16, biases f32.
    Padded lanes are zero, so ReLU(0)=0 propagates exactly through hidden
    layers; padded output lanes (= sigmoid(0)=0.5) and padded batch rows are
    sliced off by decoder_forward.
    """
    out_dims = [w.shape[1] for (w, _) in params]
    l_pad = _round_up(latent_size, 16)            # bf16 sublane pack (K dim only)
    out_pads = [_round_up(d, 128) for d in out_dims]
    in_pads = [l_pad] + out_pads[:-1]

    padded = []
    for (w, b), ip, op in zip(params, in_pads, out_pads):
        b = jnp.reshape(b, (1, -1))
        w_p = jnp.zeros((ip, op), jnp.bfloat16).at[:w.shape[0], :w.shape[1]].set(
            w.astype(jnp.bfloat16))
        b_p = jnp.zeros((1, op), jnp.float32).at[:, :b.shape[1]].set(
            b.astype(jnp.float32))
        padded.append((w_p, b_p))

    meta = {
        "latent": int(latent_size),
        "l_pad": int(l_pad),
        "in_pads": [int(x) for x in in_pads],
        "out_pads": [int(x) for x in out_pads],
        "out_dim": int(out_dims[-1]),
    }
    return padded, meta


# ---------------------------------------------------------------------------
# Forward pass.
# ---------------------------------------------------------------------------
def decoder_forward(z, padded_params, meta, *, tm=None):
    """z: [B, latent] (any float dtype); padded_params from prepare_decoder_params."""
    n_layers = len(padded_params)
    B, latent = z.shape
    assert latent == meta["latent"]
    l_pad = meta["l_pad"]
    out_pads = meta["out_pads"]
    in_pads = meta["in_pads"]
    out_dim = meta["out_dim"]
    out_pad = out_pads[-1]

    # Generation-aware tile / VMEM defaults.
    vmem_cap = _vmem_capacity_bytes()
    big_vmem = vmem_cap >= (100 << 20)            # v5e/v6e (128 MiB) vs v7x (64 MiB)
    if tm is None:
        tm = 512 if big_vmem else 256
    vmem_clamp = int(0.75 * vmem_cap)             # ~96 MiB v5e/v6e, ~48 MiB v7x

    # Batch tiling: small batches -> one full tile; otherwise ensure >= 2 grid
    # steps so the activation DMA overlaps compute (and megacore splits).
    if B <= tm:
        tm = max(16, _round_up(B, 16))
    else:
        tm = min(tm, max(16, _round_up((B + 1) // 2, 16)))
    b_pad = _round_up(B, tm)

    # Pad + cast only the activations (cheap: latent is padded to 16, not 128).
    z_p = jnp.zeros((b_pad, l_pad), jnp.bfloat16).at[:B, :latent].set(
        z.astype(jnp.bfloat16))

    # Specs: batch-tiled z/out, constant-index (VMEM-resident) params.
    flat_params = []
    in_specs = [pl.BlockSpec((tm, l_pad), lambda i: (i, 0))]
    for (w_p, b_p), ip, op in zip(padded_params, in_pads, out_pads):
        flat_params.extend([w_p, b_p])
        in_specs.append(pl.BlockSpec((ip, op), lambda i: (0, 0)))
        in_specs.append(pl.BlockSpec((1, op), lambda i: (0, 0)))

    # Honest VMEM budget: double-buffered z (bf16) and out (f32) tiles,
    # params counted twice (default pipelining double-buffers even constant
    # blocks), per-layer activation temporaries, plus fixed headroom.
    param_bytes = sum(w.size * w.dtype.itemsize + b.size * b.dtype.itemsize
                      for (w, b) in padded_params)
    vmem_bytes = (2 * tm * l_pad * 2
                  + 2 * tm * out_pad * 4
                  + 2 * param_bytes
                  + tm * sum(out_pads) * 4
                  + (2 << 20))
    vmem_limit = int(min(max(vmem_bytes, 16 << 20), vmem_clamp))

    # Advisory cost estimate for the XLA scheduler.
    flops = 2 * b_pad * sum(ip * op for ip, op in zip(in_pads, out_pads))
    bytes_accessed = (z_p.size * 2 + b_pad * out_pad * 4 + param_bytes)
    cost = pl.CostEstimate(flops=flops,
                           transcendentals=b_pad * out_pad,
                           bytes_accessed=bytes_accessed)

    kernel = functools.partial(_decoder_mlp_kernel, n_layers)
    out_padded = pl.pallas_call(
        kernel,
        out_shape=jax.ShapeDtypeStruct((b_pad, out_pad), jnp.float32),
        grid=(b_pad // tm,),
        in_specs=in_specs,
        out_specs=pl.BlockSpec((tm, out_pad), lambda i: (i, 0)),
        compiler_params=pltpu.CompilerParams(
            dimension_semantics=("parallel",),    # megacore on v7x
            vmem_limit_bytes=vmem_limit),
        cost_estimate=cost,
    )(z_p, *flat_params)

    # Only slice / cast when padding actually exists (avoids an extra copy).
    out = out_padded
    if b_pad != B or out_pad != out_dim:
        out = out[:B, :out_dim]
    if out.dtype != z.dtype:
        out = out.astype(z.dtype)
    return out


# ---------------------------------------------------------------------------
# PyTorch-style init + pure-JAX reference.
# ---------------------------------------------------------------------------
def init_decoder_params(key, latent_size, layer_sizes):
    """PyTorch nn.Linear-style uniform(+-1/sqrt(fan_in)) init; f32, W stored [in,out]."""
    params = []
    in_sizes = [latent_size] + list(layer_sizes[:-1])
    for in_size, out_size in zip(in_sizes, layer_sizes):
        key, kw, kb = jax.random.split(key, 3)
        bound = 1.0 / float(in_size) ** 0.5
        w = jax.random.uniform(kw, (in_size, out_size), jnp.float32,
                               minval=-bound, maxval=bound)
        b = jax.random.uniform(kb, (1, out_size), jnp.float32,
                               minval=-bound, maxval=bound)
        params.append((w, b))
    return params


def decoder_reference(z, params):
    """Pure-JAX reference with the same bf16-matmul / f32-accumulate precision."""
    h = z.astype(jnp.float32)
    n = len(params)
    for i, (w, b) in enumerate(params):
        h = jnp.dot(h.astype(jnp.bfloat16), w.astype(jnp.bfloat16),
                    preferred_element_type=jnp.float32) + b.astype(jnp.float32)
        h = jnp.maximum(h, 0.0) if i + 1 < n else jax.nn.sigmoid(h)
    return h.astype(z.dtype)


if __name__ == "__main__":
    # Small shapes consistent with Decoder(layer_sizes, latent_size, ...).
    batch = 2
    latent_size = 8
    layer_sizes = [32, 64, 128]   # hidden layers + output layer (last = sigmoid)

    key = jax.random.PRNGKey(0)
    key_z, key_p = jax.random.split(key)
    z = jax.random.normal(key_z, (batch, latent_size), dtype=jnp.float32)

    raw_params = init_decoder_params(key_p, latent_size, layer_sizes)
    # One-time prep: pad + cast params, then cache/reuse for every forward.
    padded_params, meta = prepare_decoder_params(raw_params, latent_size)
    padded_params = jax.tree_util.tree_map(jax.block_until_ready, padded_params)

    out = decoder_forward(z, padded_params, meta)
    out = jax.block_until_ready(out)

    ref = decoder_reference(z, raw_params)
    assert out.shape == (batch, layer_sizes[-1])
    assert jnp.allclose(out, ref, atol=2e-3, rtol=2e-3), "mismatch vs reference"

    print("KERNEL_OK")
</pallas_src>

<mosaic_0001>
module attributes {stable_mosaic.version = 11 : i64} {
  func.func @_decoder_mlp_kernel(%arg0: i32, %arg1: memref<16x16xbf16, #tpu.memory_space<vmem>>, %arg2: memref<16x128xbf16, #tpu.memory_space<vmem>>, %arg3: memref<1x128xf32, #tpu.memory_space<vmem>>, %arg4: memref<128x128xbf16, #tpu.memory_space<vmem>>, %arg5: memref<1x128xf32, #tpu.memory_space<vmem>>, %arg6: memref<128x128xbf16, #tpu.memory_space<vmem>>, %arg7: memref<1x128xf32, #tpu.memory_space<vmem>>, %arg8: memref<16x128xf32, #tpu.memory_space<vmem>>) attributes {dimension_semantics = [#tpu.dimension_semantics<parallel>], iteration_bounds = array<i64: 1>, scalar_prefetch = 0 : i64, scratch_operands = 0 : i64, tpu.core_type = #tpu.core_type<tc>, window_params = [{transform_indices = @transform_0, window_bounds = array<i64: 16, 16>}, {pipeline_mode = #tpu.pipeline_mode<synchronous>, transform_indices = @transform_1, window_bounds = array<i64: 16, 128>}, {pipeline_mode = #tpu.pipeline_mode<synchronous>, transform_indices = @transform_2, window_bounds = array<i64: 1, 128>}, {pipeline_mode = #tpu.pipeline_mode<synchronous>, transform_indices = @transform_3, window_bounds = array<i64: 128, 128>}, {pipeline_mode = #tpu.pipeline_mode<synchronous>, transform_indices = @transform_4, window_bounds = array<i64: 1, 128>}, {pipeline_mode = #tpu.pipeline_mode<synchronous>, transform_indices = @transform_5, window_bounds = array<i64: 128, 128>}, {pipeline_mode = #tpu.pipeline_mode<synchronous>, transform_indices = @transform_6, window_bounds = array<i64: 1, 128>}, {transform_indices = @transform_7, window_bounds = array<i64: 16, 128>}]} {
    %c0 = arith.constant 0 : index
    %c0_0 = arith.constant 0 : index
    %0 = vector.load %arg1[%c0, %c0_0] : memref<16x16xbf16, #tpu.memory_space<vmem>>, vector<16x16xbf16>
    %c0_1 = arith.constant 0 : index
    %c0_2 = arith.constant 0 : index
    %1 = vector.load %arg2[%c0_1, %c0_2] : memref<16x128xbf16, #tpu.memory_space<vmem>>, vector<16x128xbf16>
    %c0_3 = arith.constant 0 : index
    %c0_4 = arith.constant 0 : index
    %2 = vector.load %arg3[%c0_3, %c0_4] : memref<1x128xf32, #tpu.memory_space<vmem>>, vector<1x128xf32>
    %cst = arith.constant dense<0.000000e+00> : vector<16x128xf32>
    %3 = tpu.matmul %0, %1, %cst {dimension_numbers = #tpu.dot_dimension_numbers<[1], [0], [0], [1], [0, 0, 1, 1], [], []>} : vector<16x16xbf16>, vector<16x128xbf16>, vector<16x128xf32> -> vector<16x128xf32>
    %4 = vector.broadcast %2 : vector<1x128xf32> to vector<16x128xf32>
    %5 = arith.addf %3, %4 : vector<16x128xf32>
    %cst_5 = arith.constant 0.000000e+00 : f32
    %6 = vector.broadcast %cst_5 : f32 to vector<16x128xf32>
    %7 = arith.maximumf %5, %6 : vector<16x128xf32>
    %8 = arith.truncf %7 : vector<16x128xf32> to vector<16x128xbf16>
    %c0_6 = arith.constant 0 : index
    %c0_7 = arith.constant 0 : index
    %9 = vector.load %arg4[%c0_6, %c0_7] : memref<128x128xbf16, #tpu.memory_space<vmem>>, vector<128x128xbf16>
    %c0_8 = arith.constant 0 : index
    %c0_9 = arith.constant 0 : index
    %10 = vector.load %arg5[%c0_8, %c0_9] : memref<1x128xf32, #tpu.memory_space<vmem>>, vector<1x128xf32>
    %cst_10 = arith.constant dense<0.000000e+00> : vector<16x128xf32>
    %11 = tpu.matmul %8, %9, %cst_10 {dimension_numbers = #tpu.dot_dimension_numbers<[1], [0], [0], [1], [0, 0, 1, 1], [], []>} : vector<16x128xbf16>, vector<128x128xbf16>, vector<16x128xf32> -> vector<16x128xf32>
    %12 = vector.broadcast %10 : vector<1x128xf32> to vector<16x128xf32>
    %13 = arith.addf %11, %12 : vector<16x128xf32>
    %cst_11 = arith.constant 0.000000e+00 : f32
    %14 = vector.broadcast %cst_11 : f32 to vector<16x128xf32>
    %15 = arith.maximumf %13, %14 : vector<16x128xf32>
    %16 = arith.truncf %15 : vector<16x128xf32> to vector<16x128xbf16>
    %c0_12 = arith.constant 0 : index
    %c0_13 = arith.constant 0 : index
    %17 = vector.load %arg6[%c0_12, %c0_13] : memref<128x128xbf16, #tpu.memory_space<vmem>>, vector<128x128xbf16>
    %c0_14 = arith.constant 0 : index
    %c0_15 = arith.constant 0 : index
    %18 = vector.load %arg7[%c0_14, %c0_15] : memref<1x128xf32, #tpu.memory_space<vmem>>, vector<1x128xf32>
    %cst_16 = arith.constant dense<0.000000e+00> : vector<16x128xf32>
    %19 = tpu.matmul %16, %17, %cst_16 {dimension_numbers = #tpu.dot_dimension_numbers<[1], [0], [0], [1], [0, 0, 1, 1], [], []>} : vector<16x128xbf16>, vector<128x128xbf16>, vector<16x128xf32> -> vector<16x128xf32>
    %20 = vector.broadcast %18 : vector<1x128xf32> to vector<16x128xf32>
    %21 = arith.addf %19, %20 : vector<16x128xf32>
    %22 = arith.negf %21 : vector<16x128xf32>
    %23 = math.exp %22 : vector<16x128xf32>
    %cst_17 = arith.constant 1.000000e+00 : f32
    %24 = vector.broadcast %cst_17 : f32 to vector<16x128xf32>
    %25 = arith.addf %24, %23 : vector<16x128xf32>
    %26 = arith.divf %24, %25 : vector<16x128xf32>
    %c0_18 = arith.constant 0 : index
    %c0_19 = arith.constant 0 : index
    %27 = vector.load %arg8[%c0_18, %c0_19] : memref<16x128xf32, #tpu.memory_space<vmem>>, vector<16x128xf32>
    tpu.vector_store %arg8[%c0_18, %c0_19], %26 {strides = array<i32>} : memref<16x128xf32, #tpu.memory_space<vmem>>, vector<16x128xf32>,
    return
  }
  func.func @transform_0(%arg0: i32) -> (i32, i32) {
    %c0_i32 = arith.constant 0 : i32
    %c0_i32_0 = arith.constant 0 : i32
    return %arg0, %c0_i32 : i32, i32
  }
  func.func @transform_1(%arg0: i32) -> (i32, i32) {
    %c0_i32 = arith.constant 0 : i32
    %c0_i32_0 = arith.constant 0 : i32
    %c0_i32_1 = arith.constant 0 : i32
    return %c0_i32, %c0_i32_0 : i32, i32
  }
  func.func @transform_2(%arg0: i32) -> (i32, i32) {
    %c0_i32 = arith.constant 0 : i32
    %c0_i32_0 = arith.constant 0 : i32
    %c0_i32_1 = arith.constant 0 : i32
    return %c0_i32, %c0_i32_0 : i32, i32
  }
  func.func @transform_3(%arg0: i32) -> (i32, i32) {
    %c0_i32 = arith.constant 0 : i32
    %c0_i32_0 = arith.constant 0 : i32
    %c0_i32_1 = arith.constant 0 : i32
    return %c0_i32, %c0_i32_0 : i32, i32
  }
  func.func @transform_4(%arg0: i32) -> (i32, i32) {
    %c0_i32 = arith.constant 0 : i32
    %c0_i32_0 = arith.constant 0 : i32
    %c0_i32_1 = arith.constant 0 : i32
    return %c0_i32, %c0_i32_0 : i32, i32
  }
  func.func @transform_5(%arg0: i32) -> (i32, i32) {
    %c0_i32 = arith.constant 0 : i32
    %c0_i32_0 = arith.constant 0 : i32
    %c0_i32_1 = arith.constant 0 : i32
    return %c0_i32, %c0_i32_0 : i32, i32
  }
  func.func @transform_6(%arg0: i32) -> (i32, i32) {
    %c0_i32 = arith.constant 0 : i32
    %c0_i32_0 = arith.constant 0 : i32
    %c0_i32_1 = arith.constant 0 : i32
    return %c0_i32, %c0_i32_0 : i32, i32
  }
  func.func @transform_7(%arg0: i32) -> (i32, i32) {
    %c0_i32 = arith.constant 0 : i32
    %c0_i32_0 = arith.constant 0 : i32
    return %arg0, %c0_i32 : i32, i32
  }
}

</mosaic_0001>

<bundles_post_ra>
// kernel: tpu_custom_call.1
= control target key start
LH: loop header
LB: loop body
LE: loop exit
PB: predicated region body
PF: predicated region fallthrough
CT: control target
= control target key end

     0   :  { %12 = vsyncpa [#allocation3], 0  ;;  %s824_s0 = inlined_call_operand.hbm [shape: bf16[16,16], index: 0, kind: input, shape index: {}]   ;;  %s825_s1 = inlined_call_operand.hbm [shape: bf16[16,128], index: 1, kind: input, shape index: {}]   ;;  %s826_s2 = inlined_call_operand.vmem [shape: f32[1,128], index: 2, kind: input, shape index: {}]   ;;  %s827_s3 = inlined_call_operand.hbm [shape: bf16[128,128], index: 3, kind: input, shape index: {}]   ;;  %s828_s4 = inlined_call_operand.vmem [shape: f32[1,128], index: 4, kind: input, shape index: {}]   ;;  %s829_s5 = inlined_call_operand.hbm [shape: bf16[128,128], index: 5, kind: input, shape index: {}]   ;;  %s830_s6 = inlined_call_operand.vmem [shape: f32[1,128], index: 6, kind: input, shape index: {}]   ;;  %s831_s7 = inlined_call_operand.hbm [shape: f32[16,128], index: 7, kind: output, shape index: {}]  }
   0x1   :  { %13 = vsyncpa [#allocation6], 0 }
   0x2   :  { %14 = vsyncpa [#allocation9], 0 }
   0x3   :  { %15 = vsyncpa [#allocation4], 0  ;;  %s658_s24 = smov [#allocation5]   ;;  %s659_s26 = smov [#allocation2]  }
   0x4   :  { %s33_s25 = sshll.u32 %s658_s24, 4  ;;  %s21_s27 = sshll.u32 %s659_s26, 4  ;;  %s34_s25 = int_to_ptr.vmem [resolvable:$true] %s33_s25  ;;  %s709_s27 = int_to_ptr.vmem [resolvable:$true] %s21_s27 }
   0x5   :  { %s540_s30 = scalar_lea.hbm %s825_s1, 128 }
   0x6   :  { %p541_p0 = scmp.ne.s32.totalorder %s825_s1, %s540_s30  ;;  %p544_p1 = scmp.lt.u32.totalorder %s540_s30, %s825_s1 }
   0x8   :  { %p546_p2 = pnand %p544_p1, %p541_p0 }
   0xa   :  { %549 = shalt.err (!%p546_p2)
}
   0xb   :  { %s550_s12 = scalar_lea.vmem %s34_s25, 128  ;;  %p555_p4 = scmp.lt.s32.totalorder %s34_s25, %s34_s25 }
   0xc   :  { %p551_p3 = scmp.ne.s32.totalorder %s34_s25, %s550_s12  ;;  %p556_p5 = scmp.lt.s32.totalorder %s550_s12, %s550_s12 }
   0xe   :  { %p557_p6 = por %p556_p5, %p555_p4 }
  0x10   :  { %p558_p7 = pnand %p557_p6, %p551_p3 }
  0x12   :  { %561 = shalt.err (!%p558_p7)
}
  0x13   :  { %s660_s13 = smov 64   ;;  %s661_s14 = smov 4  }
  0x14   :  { %39 = dma.hbm_to_vmem [thread:$0]  %s825_s1, 128, %s34_s25, [#allocation6], %s660_s13, %s660_s13, %s661_s14  }
  0x15   :  { %s562_s19 = scalar_lea.hbm %s824_s0, 128 }
  0x16   :  { %p563_p8 = scmp.ne.s32.totalorder %s824_s0, %s562_s19  ;;  %p566_p9 = scmp.lt.u32.totalorder %s562_s19, %s824_s0 }
  0x18   :  { %p568_p10 = pnand %p566_p9, %p563_p8 }
  0x1a   :  { %571 = shalt.err (!%p568_p10)
}
  0x1b   :  { %s572_s24 = scalar_lea.vmem %s709_s27, 128  ;;  %p577_p12 = scmp.lt.s32.totalorder %s709_s27, %s709_s27 }
  0x1c   :  { %p573_p11 = scmp.ne.s32.totalorder %s709_s27, %s572_s24  ;;  %p578_p13 = scmp.lt.s32.totalorder %s572_s24, %s572_s24 }
  0x1e   :  { %p579_p0 = por %p578_p13, %p577_p12 }
  0x20   :  { %p580_p1 = pnand %p579_p0, %p573_p11 }
  0x22   :  { %583 = shalt.err (!%p580_p1)
}
  0x23   :  { %27 = dma.hbm_to_vmem [thread:$0]  %s824_s0, 128, %s709_s27, [#allocation3], %s660_s13, %s660_s13, %s661_s14  }
  0x24   :  { %s662_s26 = smov [#allocation7]   ;;  %s663_s29 = smov [#allocation8]  }
  0x25   :  { %s47_s28 = sshll.u32 %s662_s26, 4  ;;  %s61_s30 = sshll.u32 %s663_s29, 4  ;;  %s48_s28 = int_to_ptr.vmem [resolvable:$true] %s47_s28  ;;  %s746_s30 = int_to_ptr.vmem [resolvable:$true] %s61_s30 }
  0x26   :  { %s584_s10 = scalar_lea.hbm %s827_s3, 1024 }
  0x27   :  { %p585_p2 = scmp.ne.s32.totalorder %s827_s3, %s584_s10  ;;  %p588_p3 = scmp.lt.u32.totalorder %s584_s10, %s827_s3 }
  0x29   :  { %p590_p4 = pnand %p588_p3, %p585_p2 }
  0x2b   :  { %593 = shalt.err (!%p590_p4)
}
  0x2c   :  { %s594_s0 = scalar_lea.vmem %s48_s28, 1024  ;;  %p599_p6 = scmp.lt.s32.totalorder %s48_s28, %s48_s28 }
  0x2d   :  { %p595_p5 = scmp.ne.s32.totalorder %s48_s28, %s594_s0  ;;  %p600_p7 = scmp.lt.s32.totalorder %s594_s0, %s594_s0 }
  0x2f   :  { %p601_p8 = por %p600_p7, %p599_p6 }
  0x31   :  { %p602_p9 = pnand %p601_p8, %p595_p5 }
  0x33   :  { %605 = shalt.err (!%p602_p9)
}
  0x34   :  { %53 = dma.hbm_to_vmem [thread:$0]  %s827_s3, 1024, %s48_s28, [#allocation6], %s660_s13, %s660_s13, %s661_s14  }
  0x35   :  { %s606_s20 = scalar_lea.hbm %s829_s5, 1024 }
  0x36   :  { %p607_p10 = scmp.ne.s32.totalorder %s829_s5, %s606_s20  ;;  %p610_p11 = scmp.lt.u32.totalorder %s606_s20, %s829_s5 }
  0x38   :  { %p612_p12 = pnand %p610_p11, %p607_p10 }
  0x3a   :  { %615 = shalt.err (!%p612_p12)
}
  0x3b   :  { %s616_s1 = scalar_lea.vmem %s746_s30, 1024  ;;  %p621_p0 = scmp.lt.s32.totalorder %s746_s30, %s746_s30 }
  0x3c   :  { %p617_p13 = scmp.ne.s32.totalorder %s746_s30, %s616_s1  ;;  %p622_p1 = scmp.lt.s32.totalorder %s616_s1, %s616_s1 }
  0x3e   :  { %p623_p2 = por %p622_p1, %p621_p0 }
  0x40   :  { %p624_p3 = pnand %p623_p2, %p617_p13 }
  0x42   :  { %627 = shalt.err (!%p624_p3)
}
  0x43   :  { %67 = dma.hbm_to_vmem [thread:$0]  %s829_s5, 1024, %s746_s30, [#allocation9], %s660_s13, %s660_s13, %s661_s14  }
  0x44   :  { %650 = dma.done.wait [#allocation3], 128  }
  0x45   :  { %651 = vsyncadd [#allocation3], 4294967168 }
  0x46   :  { %652 = dma.done.wait [#allocation6], 1152  }
  0x47   :  { %653 = vsyncadd [#allocation6], 4294966144 }
  0x48   :  { %654 = dma.done.wait [#allocation9], 1024  }
  0x49   :  { %655 = vsyncadd [#allocation9], 4294966272  ;;  %v664_v0 = vmov 0.0   ;;  %vm665_vm0 = vmmov 0   ;;  %v514_v1 = vld [vmem:[#allocation5] sm:$0xff]   ;;  %v515_v2 = vld [vmem:[#allocation2] sm:$0xff]  }
  0x4a   :  { %457 = vmatprep.subr.bf16.mxu0 %v664_v0  ;;  %459 = vmatprep.mubr.msk.bf16.mxu0 %vm665_vm0, %v664_v0  ;;  %vm105_vm1 = vcmask 130048   ;;  %v516_v3 = vld [vmem:[#allocation7] sm:$0xff]   ;;  %v517_v4 = vld [vmem:[#allocation7 + $0x8] sm:$0xff]   ;;  %v518_v5 = vld [vmem:[#allocation7 + $0x10] sm:$0xff]  }
  0x4b   :  { %463 = vmatprep.subr.bf16.mxu1 %v664_v0  ;;  %479 = vmatprep.mubr.msk.bf16.mxu1 %vm665_vm0, %v664_v0  ;;  %v519_v6 = vld [vmem:[#allocation7 + $0x18] sm:$0xff]   ;;  %v520_v7 = vld [vmem:[#allocation7 + $0x20] sm:$0xff]   ;;  %v521_v8 = vld [vmem:[#allocation7 + $0x28] sm:$0xff]  }
  0x4c   :  { %458 = vmatpush3.bf16.msra.mxu0 %v514_v1  ;;  %464 = vmatpush3.bf16.msra.mxu1 %v516_v3  ;;  %v522_v9 = vld [vmem:[#allocation7 + $0x30] sm:$0xff]   ;;  %v523_v10 = vld [vmem:[#allocation7 + $0x38] sm:$0xff]   ;;  %v524_v11 = vld [vmem:[#allocation8] sm:$0xff]  }
  0x4d   :  { %483 = vmatprep.subr.bf16.mxu0 %v664_v0  ;;  %465 = vmatprep.subr.bf16.mxu1 %v664_v0  ;;  %v525_v12 = vld [vmem:[#allocation8 + $0x8] sm:$0xff]   ;;  %v526_v13 = vld [vmem:[#allocation8 + $0x10] sm:$0xff]   ;;  %v527_v14 = vld [vmem:[#allocation8 + $0x18] sm:$0xff]  }
  0x4e   :  { %v528_v15 = vld [vmem:[#allocation8 + $0x20] sm:$0xff]   ;;  %v529_v16 = vld [vmem:[#allocation8 + $0x28] sm:$0xff]   ;;  %v413_v17 = vld [vmem:[%s826_s2] ss:$0 sm:$0xff] }
  0x4f   :  { %460 = vmatmul.mubr.msk.bf16.vlgmr.msra.gmra.mrb[0].mxu0 %vm105_vm1, %v515_v2  ;;  %v530_v27 = vld [vmem:[#allocation8 + $0x30] sm:$0xff]   ;;  %v531_v28 = vld [vmem:[#allocation8 + $0x38] sm:$0xff]  }
  0x50   :  { %499 = vmatprep.mubr.msk.bf16.mxu0 %vm665_vm0, %v664_v0  ;;  %466 = vmatpush3.bf16.msra.mxu1 %v517_v4  ;;  %v417_v29 = vld [vmem:[%s828_s4] ss:$0 sm:$0xff]  ;;  %s666_s4 = smov [#allocation10]  }
  0x51   :  { %467 = vmatprep.subr.bf16.mxu1 %v664_v0  ;;  %484 = vmatpush3.bf16.msra.mxu0 %v524_v11  ;;  %v426_v39 = vld [vmem:[%s830_s6] ss:$0 sm:$0xff]  ;;  %s399_s29 = sshll.u32 %s666_s4, 4  ;;  %s400_s29 = int_to_ptr.vmem [resolvable:$true] %s399_s29 }
  0x52   :  { %485 = vmatprep.subr.bf16.mxu0 %v664_v0  ;;  %s628_s6 = scalar_lea.vmem %s400_s29, 256  ;;  %p633_p5 = scmp.lt.s32.totalorder %s400_s29, %s400_s29 }
  0x53   :  { %p629_p4 = scmp.ne.s32.totalorder %s400_s29, %s628_s6  ;;  %p634_p6 = scmp.lt.s32.totalorder %s628_s6, %s628_s6 }
  0x54   :  { %468 = vmatpush3.bf16.msra.mxu1 %v518_v5 }
  0x55   :  { %469 = vmatprep.subr.bf16.mxu1 %v664_v0  ;;  %486 = vmatpush3.bf16.msra.mxu0 %v525_v12  ;;  %p635_p7 = por %p634_p6, %p633_p5 }
  0x56   :  { %487 = vmatprep.subr.bf16.mxu0 %v664_v0 }
  0x57   :  { %p636_p8 = pnand %p635_p7, %p629_p4 }
  0x58   :  { %470 = vmatpush3.bf16.msra.mxu1 %v519_v6 }
  0x59   :  { %471 = vmatprep.subr.bf16.mxu1 %v664_v0  ;;  %488 = vmatpush3.bf16.msra.mxu0 %v526_v13 }
  0x5a   :  { %489 = vmatprep.subr.bf16.mxu0 %v664_v0 }
  0x5c   :  { %472 = vmatpush3.bf16.msra.mxu1 %v520_v7 }
  0x5d   :  { %473 = vmatprep.subr.bf16.mxu1 %v664_v0  ;;  %490 = vmatpush3.bf16.msra.mxu0 %v527_v14 }
  0x5e   :  { %491 = vmatprep.subr.bf16.mxu0 %v664_v0 }
  0x60   :  { %474 = vmatpush3.bf16.msra.mxu1 %v521_v8 }
  0x61   :  { %475 = vmatprep.subr.bf16.mxu1 %v664_v0  ;;  %492 = vmatpush3.bf16.msra.mxu0 %v528_v15 }
  0x62   :  { %493 = vmatprep.subr.bf16.mxu0 %v664_v0 }
  0x64   :  { %476 = vmatpush3.bf16.msra.mxu1 %v522_v9 }
  0x65   :  { %477 = vmatprep.subr.bf16.mxu1 %v664_v0  ;;  %494 = vmatpush3.bf16.msra.mxu0 %v529_v16 }
  0x66   :  { %495 = vmatprep.subr.bf16.mxu0 %v664_v0 }
  0x68   :  { %478 = vmatpush3.bf16.msra.mxu1 %v523_v10 }
  0x69   :  { %496 = vmatpush3.bf16.msra.mxu0 %v530_v27 }
  0x6a   :  { %497 = vmatprep.subr.bf16.mxu0 %v664_v0 }
  0x6d   :  { %498 = vmatpush3.bf16.msra.mxu0 %v531_v28 }
 0x122   :  { %v143_v18 = vpop.f32.mrb[0].mxu0 }
 0x123   :  { %v144_v19 = vadd.f32 %v413_v17, %v143_v18  ;;  %v461_v20 = vpop.f32.mrb[1].mxu0 }
 0x124   :  { %v146_v21 = vpop.f32.mrb[2].mxu0 }
 0x125   :  { %v147_v22 = vadd.f32 %v413_v17, %v146_v21  ;;  %v462_v23 = vpop.f32.mrb[3].mxu0  ;;  %v150_v24 = vmax.f32 %v144_v19, 0.0 }
 0x127   :  { %v151_v25 = vmax.f32 %v147_v22, 0.0 }
 0x129   :  { %v152_v26 = vpack.c.bf16 %v151_v25, %v150_v24 }
 0x12b   :  { %480 = vmatmul.mubr.bf16.vlgmr.msra.gmra.mrb[0].mxu1 %v152_v26 }
 0x1fe   :  { %v258_v30 = vpop.f32.mrb[0].mxu1 }
 0x1ff   :  { %v259_v31 = vadd.f32 %v417_v29, %v258_v30  ;;  %v481_v32 = vpop.f32.mrb[1].mxu1 }
 0x200   :  { %v261_v33 = vpop.f32.mrb[2].mxu1 }
 0x201   :  { %v262_v34 = vadd.f32 %v417_v29, %v261_v33  ;;  %v482_v35 = vpop.f32.mrb[3].mxu1  ;;  %v265_v36 = vmax.f32 %v259_v31, 0.0 }
 0x203   :  { %v266_v37 = vmax.f32 %v262_v34, 0.0 }
 0x205   :  { %v267_v38 = vpack.c.bf16 %v266_v37, %v265_v36 }
 0x207   :  { %500 = vmatmul.mubr.bf16.vlgmr.msra.gmra.mrb[4].mxu0 %v267_v38 }
 0x2da   :  { %v373_v40 = vpop.f32.mrb[4].mxu0 }
 0x2db   :  { %v374_v41 = vadd.f32 %v426_v39, %v373_v40  ;;  %v501_v42 = vpop.f32.mrb[5].mxu0 }
 0x2dc   :  { %v376_v43 = vpop.f32.mrb[6].mxu0 }
 0x2dd   :  { %v435_v44 = vmul.f32 -1.442695, %v374_v41  ;;  %v377_v45 = vadd.f32 %v426_v39, %v376_v43  ;;  %v502_v46 = vpop.f32.mrb[7].mxu0 }
 0x2df   :  { %532 = vpow2.f32 %v435_v44  ;;  %v436_v47 = vmul.f32 -1.442695, %v377_v45 }
 0x2e1   :  { %534 = vpow2.f32 %v436_v47 }
 0x2e9   :  { %v533_v48 = vpop.eup %532 }
 0x2ea   :  { %v386_v49 = vadd.f32 1.0, %v533_v48 }
 0x2eb   :  { %v535_v50 = vpop.eup %534 }
 0x2ec   :  { %536 = vrcp.f32 %v386_v49  ;;  %v387_v51 = vadd.f32 1.0, %v535_v50 }
 0x2ee   :  { %538 = vrcp.f32 %v387_v51 }
 0x2f6   :  { %v537_v52 = vpop.eup %536 }
 0x2f7   :  { %392 = vst [vmem:[#allocation10] sm:$0xff] %v537_v52 }
 0x2f8   :  { %v539_v53 = vpop.eup %538 }
 0x2f9   :  { %393 = vst [vmem:[#allocation10 + $0x8] sm:$0xff] %v539_v53 }
 0x2fa   :  { %639 = shalt.err (!%p636_p8)
}
 0x2fb   :  { %s640_s9 = scalar_lea.hbm %s831_s7, 256 }
 0x2fc   :  { %p641_p9 = scmp.ne.s32.totalorder %s831_s7, %s640_s9  ;;  %p644_p10 = scmp.lt.u32.totalorder %s640_s9, %s831_s7 }
 0x2fe   :  { %p646_p11 = pnand %p644_p10, %p641_p9 }
 0x300   :  { %649 = shalt.err (!%p646_p11)
}
 0x301   :  { %s667_s16 = smov 128   ;;  %s668_s0 = smov 8  }
 0x302   :  { %405 = dma.vmem_to_hbm [thread:$0]  %s400_s29, 256, %s831_s7, [#allocation4], %s667_s16, %s667_s16, %s668_s0  }
 0x303   :  { %656 = dma.done.wait [#allocation4], 256  }
 0x304   :  { %657 = vsyncadd [#allocation4], 4294967040 }
 0x305   :  { %409 = vsyncpa [#allocation3], 1 }
 0x306   :  { %410 = vsyncpa [#allocation6], 1 }
 0x307   :  { %411 = vsyncpa [#allocation9], 1 }
 0x308   :  { %412 = vsyncpa [#allocation4], 1 }

</bundles_post_ra>
